<compile_context>
chip_gen: v7x
topology: tpu7x:2x2x1
jax: 0.10.0
libtpu: 0.0.40
codegen_flags: <defaults>
</compile_context>

<pallas_src>
import jax
import jax.numpy as jnp
from jax.experimental import pallas as pl
from jax.experimental.pallas import tpu as pltpu


def lstm_pos_kernel(tok_ref, xg_tbl_ref, whh_ref, wfc_ref, bfc_ref, out_ref):
    """Fused embedding-lookup + LSTM recurrence + padded FC, one invocation.

    tok_ref    : (S*BP, 1) int32  token ids, time-major (row = t*BP + b)
    xg_tbl_ref : (Vp, 4H)  f32    emb_table @ W_ih^T + (b_ih + b_hh), row-padded
    whh_ref    : (H, 4H)   f32    W_hh^T
    wfc_ref    : (H, TP)   f32    fc weight^T, zero-padded to TP=128 lanes
    bfc_ref    : (1, TP)   f32    fc bias, zero-padded
    out_ref    : (BP, S*TP) f32   logits; step t lives in lanes [t*TP,(t+1)*TP)
    """
    N = tok_ref.shape[0]
    Vp = xg_tbl_ref.shape[0]
    H, TP = wfc_ref.shape
    BP = out_ref.shape[0]
    S = N // BP
    f32 = jnp.float32

    # Embedding + input-projection lookup as an exact one-hot MXU matmul
    # (each output element accumulates exactly one nonzero product -> exact).
    tok = jnp.broadcast_to(tok_ref[...], (N, Vp))                    # (N, Vp)
    onehot = (jax.lax.broadcasted_iota(jnp.int32, (N, Vp), 1) == tok).astype(f32)
    xg_all = jnp.dot(onehot, xg_tbl_ref[...],
                     preferred_element_type=f32)                     # (N, 4H)

    whh = whh_ref[...]                                               # (H, 4H)
    wfc = wfc_ref[...]                                               # (H, TP)
    bfc = jnp.broadcast_to(bfc_ref[...], (BP, TP))                   # hoisted

    h = jnp.zeros((BP, H), f32)
    c = jnp.zeros((BP, H), f32)

    for t in range(S):                       # static unroll; S is small
        xg_t = xg_all[t * BP:(t + 1) * BP, :]          # sublane-aligned slice
        # Only the recurrent half of the gate matmul is on the serial chain;
        # bias is already folded into xg_t.
        gates = xg_t + jnp.dot(h, whh, preferred_element_type=f32)   # (BP, 4H)
        sg = jax.nn.sigmoid(gates)           # full-vreg EUP push
        tg = jnp.tanh(gates)                 # full-vreg EUP push
        i_g = sg[:, 0 * H:1 * H]
        f_g = sg[:, 1 * H:2 * H]
        g_g = tg[:, 2 * H:3 * H]
        o_g = sg[:, 3 * H:4 * H]
        c = f_g * c + i_g * g_g
        h = o_g * jnp.tanh(c)
        # Lane-dense FC store (off the recurrent critical path): one unmasked
        # (8,128) vreg write into the 128-aligned lane slot for step t.
        out_ref[:, t * TP:(t + 1) * TP] = (
            jnp.dot(h, wfc, preferred_element_type=f32) + bfc)


def prepare_params(params):
    """One-time parameter preparation (hoisted out of the per-call jit path)."""
    emb = params["embedding"]                              # (V, E)
    w_ih = params["w_ih"]                                  # (4H, E) PyTorch layout
    w_hh = params["w_hh"]                                  # (4H, H)
    b = params["b_ih"] + params["b_hh"]                    # (4H,)
    w_fc = params["w_fc"]                                  # (T, H)
    b_fc = params["b_fc"]                                  # (T,)

    V = emb.shape[0]
    H = w_hh.shape[1]
    T = w_fc.shape[0]
    Vp = ((V + 7) // 8) * 8                                # sublane-pad vocab rows
    TP = ((T + 127) // 128) * 128                          # lane-pad FC output

    # Fuse embedding lookup with the input projection and both biases:
    # xg_table[v] = emb[v] @ W_ih^T + b_ih + b_hh   (gather-then-matmul ==
    # matmul-then-gather, so forward semantics are unchanged).
    xg_table = jnp.zeros((Vp, 4 * H), jnp.float32)
    xg_table = xg_table.at[:V, :].set(emb @ w_ih.T + b[None, :])

    w_fc_tp = jnp.zeros((H, TP), jnp.float32).at[:, :T].set(w_fc.T)
    b_fc_tp = jnp.zeros((1, TP), jnp.float32).at[0, :T].set(b_fc)

    return {
        "xg_table": xg_table,                              # (Vp, 4H)
        "w_hh_t": jnp.transpose(w_hh),                     # (H, 4H)
        "w_fc_tp": w_fc_tp,                                # (H, TP)
        "b_fc_tp": b_fc_tp,                                # (1, TP)
    }


def lstm_pos_forward(x_tokens, prep, *, tagset_size, pad_idx):
    """x_tokens: (B, S) int32 token ids -> logits (B, S, tagset), batch_first."""
    B, S = x_tokens.shape
    H = prep["w_hh_t"].shape[0]
    TP = prep["w_fc_tp"].shape[1]
    BP = ((B + 7) // 8) * 8                                # pad batch to sublanes

    # Pad batch with pad_idx tokens (embedding row zero -> xg row is just the
    # bias); time-major flatten so per-step slices are sublane-aligned.
    tok_p = jnp.full((BP, S), pad_idx, jnp.int32).at[:B, :].set(x_tokens)
    tok_tm = jnp.transpose(tok_p).reshape(S * BP, 1)       # (S*BP, 1)

    vmem = pltpu.MemorySpace.VMEM
    out = pl.pallas_call(
        lstm_pos_kernel,
        out_shape=jax.ShapeDtypeStruct((BP, S * TP), jnp.float32),
        in_specs=[pl.BlockSpec(memory_space=vmem)] * 5,    # whole arrays in VMEM
        out_specs=pl.BlockSpec(memory_space=vmem),
    )(tok_tm, prep["xg_table"], prep["w_hh_t"], prep["w_fc_tp"], prep["b_fc_tp"])

    # Free reshape (row-major contiguous) + slice off batch pad and lane pad.
    return out.reshape(BP, S, TP)[:B, :, :tagset_size]


def reference_forward(x_tokens, params):
    """Pure-JAX reference matching PyTorch nn.LSTM / nn.Linear semantics."""
    emb = jnp.take(params["embedding"], x_tokens, axis=0)  # (B, S, E)
    w_ih, w_hh = params["w_ih"], params["w_hh"]
    b = params["b_ih"] + params["b_hh"]
    H = w_hh.shape[1]

    def step(carry, x_t):
        h, c = carry
        gates = x_t @ w_ih.T + h @ w_hh.T + b
        i = jax.nn.sigmoid(gates[:, 0 * H:1 * H])
        f = jax.nn.sigmoid(gates[:, 1 * H:2 * H])
        g = jnp.tanh(gates[:, 2 * H:3 * H])
        o = jax.nn.sigmoid(gates[:, 3 * H:4 * H])
        c = f * c + i * g
        h = o * jnp.tanh(c)
        return (h, c), h

    B = x_tokens.shape[0]
    init = (jnp.zeros((B, H), jnp.float32), jnp.zeros((B, H), jnp.float32))
    _, hs = jax.lax.scan(step, init, jnp.transpose(emb, (1, 0, 2)))  # (S, B, H)
    lstm_out = jnp.transpose(hs, (1, 0, 2))                          # (B, S, H)
    return lstm_out @ params["w_fc"].T + params["b_fc"]


def init_params(key, vocab_size, tagset_size, embed_dim, hidden_dim,
                pad_idx=0):
    ks = jax.random.split(key, 7)
    bound = 1.0 / jnp.sqrt(hidden_dim)

    emb = jax.random.normal(ks[0], (vocab_size, embed_dim), jnp.float32)
    emb = emb.at[pad_idx].set(0.0)       # nn.Embedding padding_idx row is zero

    def uni(k, shape):
        return jax.random.uniform(k, shape, jnp.float32, -bound, bound)

    return {
        "embedding": emb,
        "w_ih": uni(ks[1], (4 * hidden_dim, embed_dim)),
        "w_hh": uni(ks[2], (4 * hidden_dim, hidden_dim)),
        "b_ih": uni(ks[3], (4 * hidden_dim,)),
        "b_hh": uni(ks[4], (4 * hidden_dim,)),
        "w_fc": uni(ks[5], (tagset_size, hidden_dim)),
        "b_fc": uni(ks[6], (tagset_size,)),
    }


if __name__ == "__main__":
    # Small shapes consistent with the module's forward:
    VOCAB, TAGSET, EMBED, HIDDEN = 50, 12, 32, 32
    BATCH, SEQ = 2, 8
    PAD_IDX = 0

    key = jax.random.PRNGKey(0)
    k_params, k_tokens = jax.random.split(key)
    params = init_params(k_params, VOCAB, TAGSET, EMBED, HIDDEN, pad_idx=PAD_IDX)
    prep = jax.tree_util.tree_map(jax.block_until_ready,
                                  prepare_params(params))   # one-time prep

    x = jax.random.randint(k_tokens, (BATCH, SEQ), 0, VOCAB, dtype=jnp.int32)

    fwd = jax.jit(lstm_pos_forward, static_argnames=("tagset_size", "pad_idx"))
    logits = jax.block_until_ready(fwd(x, prep, tagset_size=TAGSET,
                                       pad_idx=PAD_IDX))
    ref = jax.block_until_ready(reference_forward(x, params))

    assert logits.shape == (BATCH, SEQ, TAGSET), logits.shape
    # NOTE: TPU f32 matmuls use XLA/Mosaic default precision in both kernel and
    # reference; the fused bias/one-hot association differs slightly from the
    # PyTorch op order, so compare at 2e-4 rather than bit-exact.
    assert jnp.allclose(logits, ref, atol=2e-4, rtol=2e-4), (
        float(jnp.max(jnp.abs(logits - ref))))

    print("KERNEL_OK")
</pallas_src>

<mosaic_0001>
module attributes {stable_mosaic.version = 11 : i64} {
  func.func @lstm_pos_kernel(%arg0: memref<64x1xi32, #tpu.memory_space<vmem>>, %arg1: memref<56x128xf32, #tpu.memory_space<vmem>>, %arg2: memref<32x128xf32, #tpu.memory_space<vmem>>, %arg3: memref<32x128xf32, #tpu.memory_space<vmem>>, %arg4: memref<1x128xf32, #tpu.memory_space<vmem>>, %arg5: memref<8x1024xf32, #tpu.memory_space<vmem>>) attributes {dimension_semantics = [], scalar_prefetch = 0 : i64, scratch_operands = 0 : i64, tpu.core_type = #tpu.core_type<tc>} {
    %c0 = arith.constant 0 : index
    %c0_0 = arith.constant 0 : index
    %0 = vector.load %arg0[%c0, %c0_0] : memref<64x1xi32, #tpu.memory_space<vmem>>, vector<64x1xi32>
    %1 = vector.shape_cast %0 : vector<64x1xi32> to vector<64x1xi32>
    %2 = vector.broadcast %1 : vector<64x1xi32> to vector<64x56xi32>
    %3 = tpu.iota {dimensions = array<i32: 1>} : vector<64x56xi32>
    %4 = arith.cmpi eq, %3, %2 : vector<64x56xi32>
    %5 = arith.extui %4 : vector<64x56xi1> to vector<64x56xi32>
    %6 = arith.sitofp %5 : vector<64x56xi32> to vector<64x56xf32>
    %c0_1 = arith.constant 0 : index
    %c0_2 = arith.constant 0 : index
    %7 = vector.load %arg1[%c0_1, %c0_2] : memref<56x128xf32, #tpu.memory_space<vmem>>, vector<56x128xf32>
    %cst = arith.constant dense<0.000000e+00> : vector<64x128xf32>
    %8 = tpu.matmul %6, %7, %cst {dimension_numbers = #tpu.dot_dimension_numbers<[1], [0], [0], [1], [0, 0, 1, 1], [], []>} : vector<64x56xf32>, vector<56x128xf32>, vector<64x128xf32> -> vector<64x128xf32>
    %c0_3 = arith.constant 0 : index
    %c0_4 = arith.constant 0 : index
    %9 = vector.load %arg2[%c0_3, %c0_4] : memref<32x128xf32, #tpu.memory_space<vmem>>, vector<32x128xf32>
    %c0_5 = arith.constant 0 : index
    %c0_6 = arith.constant 0 : index
    %10 = vector.load %arg3[%c0_5, %c0_6] : memref<32x128xf32, #tpu.memory_space<vmem>>, vector<32x128xf32>
    %c0_7 = arith.constant 0 : index
    %c0_8 = arith.constant 0 : index
    %11 = vector.load %arg4[%c0_7, %c0_8] : memref<1x128xf32, #tpu.memory_space<vmem>>, vector<1x128xf32>
    %12 = vector.shape_cast %11 : vector<1x128xf32> to vector<1x128xf32>
    %13 = vector.broadcast %12 : vector<1x128xf32> to vector<8x128xf32>
    %cst_9 = arith.constant 0.000000e+00 : f32
    %14 = vector.broadcast %cst_9 : f32 to vector<8x32xf32>
    %cst_10 = arith.constant 0.000000e+00 : f32
    %15 = vector.broadcast %cst_10 : f32 to vector<8x32xf32>
    %16 = vector.extract_strided_slice %8 {offsets = [0, 0], sizes = [8, 128], strides = [1, 1]} : vector<64x128xf32> to vector<8x128xf32>
    %cst_11 = arith.constant dense<0.000000e+00> : vector<8x128xf32>
    %17 = tpu.matmul %14, %9, %cst_11 {dimension_numbers = #tpu.dot_dimension_numbers<[1], [0], [0], [1], [0, 0, 1, 1], [], []>} : vector<8x32xf32>, vector<32x128xf32>, vector<8x128xf32> -> vector<8x128xf32>
    %18 = arith.addf %16, %17 : vector<8x128xf32>
    %19 = arith.negf %18 : vector<8x128xf32>
    %20 = math.exp %19 : vector<8x128xf32>
    %cst_12 = arith.constant 1.000000e+00 : f32
    %21 = vector.broadcast %cst_12 : f32 to vector<8x128xf32>
    %22 = arith.addf %21, %20 : vector<8x128xf32>
    %23 = arith.divf %21, %22 : vector<8x128xf32>
    %24 = math.tanh %18 : vector<8x128xf32>
    %25 = vector.extract_strided_slice %23 {offsets = [0, 0], sizes = [8, 32], strides = [1, 1]} : vector<8x128xf32> to vector<8x32xf32>
    %26 = vector.extract_strided_slice %23 {offsets = [0, 32], sizes = [8, 32], strides = [1, 1]} : vector<8x128xf32> to vector<8x32xf32>
    %27 = vector.extract_strided_slice %24 {offsets = [0, 64], sizes = [8, 32], strides = [1, 1]} : vector<8x128xf32> to vector<8x32xf32>
    %28 = vector.extract_strided_slice %23 {offsets = [0, 96], sizes = [8, 32], strides = [1, 1]} : vector<8x128xf32> to vector<8x32xf32>
    %29 = arith.mulf %26, %15 : vector<8x32xf32>
    %30 = arith.mulf %25, %27 : vector<8x32xf32>
    %31 = arith.addf %29, %30 : vector<8x32xf32>
    %32 = math.tanh %31 : vector<8x32xf32>
    %33 = arith.mulf %28, %32 : vector<8x32xf32>
    %cst_13 = arith.constant dense<0.000000e+00> : vector<8x128xf32>
    %34 = tpu.matmul %33, %10, %cst_13 {dimension_numbers = #tpu.dot_dimension_numbers<[1], [0], [0], [1], [0, 0, 1, 1], [], []>} : vector<8x32xf32>, vector<32x128xf32>, vector<8x128xf32> -> vector<8x128xf32>
    %35 = arith.addf %34, %13 : vector<8x128xf32>
    %c0_14 = arith.constant 0 : index
    %c0_15 = arith.constant 0 : index
    %36 = vector.load %arg5[%c0_14, %c0_15] : memref<8x1024xf32, #tpu.memory_space<vmem>>, vector<8x128xf32>
    tpu.vector_store %arg5[%c0_14, %c0_15], %35 {strides = array<i32>} : memref<8x1024xf32, #tpu.memory_space<vmem>>, vector<8x128xf32>,
    %37 = vector.extract_strided_slice %8 {offsets = [8, 0], sizes = [8, 128], strides = [1, 1]} : vector<64x128xf32> to vector<8x128xf32>
    %cst_16 = arith.constant dense<0.000000e+00> : vector<8x128xf32>
    %38 = tpu.matmul %33, %9, %cst_16 {dimension_numbers = #tpu.dot_dimension_numbers<[1], [0], [0], [1], [0, 0, 1, 1], [], []>} : vector<8x32xf32>, vector<32x128xf32>, vector<8x128xf32> -> vector<8x128xf32>
    %39 = arith.addf %37, %38 : vector<8x128xf32>
    %40 = arith.negf %39 : vector<8x128xf32>
    %41 = math.exp %40 : vector<8x128xf32>
    %cst_17 = arith.constant 1.000000e+00 : f32
    %42 = vector.broadcast %cst_17 : f32 to vector<8x128xf32>
    %43 = arith.addf %42, %41 : vector<8x128xf32>
    %44 = arith.divf %42, %43 : vector<8x128xf32>
    %45 = math.tanh %39 : vector<8x128xf32>
    %46 = vector.extract_strided_slice %44 {offsets = [0, 0], sizes = [8, 32], strides = [1, 1]} : vector<8x128xf32> to vector<8x32xf32>
    %47 = vector.extract_strided_slice %44 {offsets = [0, 32], sizes = [8, 32], strides = [1, 1]} : vector<8x128xf32> to vector<8x32xf32>
    %48 = vector.extract_strided_slice %45 {offsets = [0, 64], sizes = [8, 32], strides = [1, 1]} : vector<8x128xf32> to vector<8x32xf32>
    %49 = vector.extract_strided_slice %44 {offsets = [0, 96], sizes = [8, 32], strides = [1, 1]} : vector<8x128xf32> to vector<8x32xf32>
    %50 = arith.mulf %47, %31 : vector<8x32xf32>
    %51 = arith.mulf %46, %48 : vector<8x32xf32>
    %52 = arith.addf %50, %51 : vector<8x32xf32>
    %53 = math.tanh %52 : vector<8x32xf32>
    %54 = arith.mulf %49, %53 : vector<8x32xf32>
    %cst_18 = arith.constant dense<0.000000e+00> : vector<8x128xf32>
    %55 = tpu.matmul %54, %10, %cst_18 {dimension_numbers = #tpu.dot_dimension_numbers<[1], [0], [0], [1], [0, 0, 1, 1], [], []>} : vector<8x32xf32>, vector<32x128xf32>, vector<8x128xf32> -> vector<8x128xf32>
    %56 = arith.addf %55, %13 : vector<8x128xf32>
    %c0_19 = arith.constant 0 : index
    %c128 = arith.constant 128 : index
    %57 = vector.load %arg5[%c0_19, %c128] : memref<8x1024xf32, #tpu.memory_space<vmem>>, vector<8x128xf32>
    tpu.vector_store %arg5[%c0_19, %c128], %56 {strides = array<i32>} : memref<8x1024xf32, #tpu.memory_space<vmem>>, vector<8x128xf32>,
    %58 = vector.extract_strided_slice %8 {offsets = [16, 0], sizes = [8, 128], strides = [1, 1]} : vector<64x128xf32> to vector<8x128xf32>
    %cst_20 = arith.constant dense<0.000000e+00> : vector<8x128xf32>
    %59 = tpu.matmul %54, %9, %cst_20 {dimension_numbers = #tpu.dot_dimension_numbers<[1], [0], [0], [1], [0, 0, 1, 1], [], []>} : vector<8x32xf32>, vector<32x128xf32>, vector<8x128xf32> -> vector<8x128xf32>
    %60 = arith.addf %58, %59 : vector<8x128xf32>
    %61 = arith.negf %60 : vector<8x128xf32>
    %62 = math.exp %61 : vector<8x128xf32>
    %cst_21 = arith.constant 1.000000e+00 : f32
    %63 = vector.broadcast %cst_21 : f32 to vector<8x128xf32>
    %64 = arith.addf %63, %62 : vector<8x128xf32>
    %65 = arith.divf %63, %64 : vector<8x128xf32>
    %66 = math.tanh %60 : vector<8x128xf32>
    %67 = vector.extract_strided_slice %65 {offsets = [0, 0], sizes = [8, 32], strides = [1, 1]} : vector<8x128xf32> to vector<8x32xf32>
    %68 = vector.extract_strided_slice %65 {offsets = [0, 32], sizes = [8, 32], strides = [1, 1]} : vector<8x128xf32> to vector<8x32xf32>
    %69 = vector.extract_strided_slice %66 {offsets = [0, 64], sizes = [8, 32], strides = [1, 1]} : vector<8x128xf32> to vector<8x32xf32>
    %70 = vector.extract_strided_slice %65 {offsets = [0, 96], sizes = [8, 32], strides = [1, 1]} : vector<8x128xf32> to vector<8x32xf32>
    %71 = arith.mulf %68, %52 : vector<8x32xf32>
    %72 = arith.mulf %67, %69 : vector<8x32xf32>
    %73 = arith.addf %71, %72 : vector<8x32xf32>
    %74 = math.tanh %73 : vector<8x32xf32>
    %75 = arith.mulf %70, %74 : vector<8x32xf32>
    %cst_22 = arith.constant dense<0.000000e+00> : vector<8x128xf32>
    %76 = tpu.matmul %75, %10, %cst_22 {dimension_numbers = #tpu.dot_dimension_numbers<[1], [0], [0], [1], [0, 0, 1, 1], [], []>} : vector<8x32xf32>, vector<32x128xf32>, vector<8x128xf32> -> vector<8x128xf32>
    %77 = arith.addf %76, %13 : vector<8x128xf32>
    %c0_23 = arith.constant 0 : index
    %c256 = arith.constant 256 : index
    %78 = vector.load %arg5[%c0_23, %c256] : memref<8x1024xf32, #tpu.memory_space<vmem>>, vector<8x128xf32>
    tpu.vector_store %arg5[%c0_23, %c256], %77 {strides = array<i32>} : memref<8x1024xf32, #tpu.memory_space<vmem>>, vector<8x128xf32>,
    %79 = vector.extract_strided_slice %8 {offsets = [24, 0], sizes = [8, 128], strides = [1, 1]} : vector<64x128xf32> to vector<8x128xf32>
    %cst_24 = arith.constant dense<0.000000e+00> : vector<8x128xf32>
    %80 = tpu.matmul %75, %9, %cst_24 {dimension_numbers = #tpu.dot_dimension_numbers<[1], [0], [0], [1], [0, 0, 1, 1], [], []>} : vector<8x32xf32>, vector<32x128xf32>, vector<8x128xf32> -> vector<8x128xf32>
    %81 = arith.addf %79, %80 : vector<8x128xf32>
    %82 = arith.negf %81 : vector<8x128xf32>
    %83 = math.exp %82 : vector<8x128xf32>
    %cst_25 = arith.constant 1.000000e+00 : f32
    %84 = vector.broadcast %cst_25 : f32 to vector<8x128xf32>
    %85 = arith.addf %84, %83 : vector<8x128xf32>
    %86 = arith.divf %84, %85 : vector<8x128xf32>
    %87 = math.tanh %81 : vector<8x128xf32>
    %88 = vector.extract_strided_slice %86 {offsets = [0, 0], sizes = [8, 32], strides = [1, 1]} : vector<8x128xf32> to vector<8x32xf32>
    %89 = vector.extract_strided_slice %86 {offsets = [0, 32], sizes = [8, 32], strides = [1, 1]} : vector<8x128xf32> to vector<8x32xf32>
    %90 = vector.extract_strided_slice %87 {offsets = [0, 64], sizes = [8, 32], strides = [1, 1]} : vector<8x128xf32> to vector<8x32xf32>
    %91 = vector.extract_strided_slice %86 {offsets = [0, 96], sizes = [8, 32], strides = [1, 1]} : vector<8x128xf32> to vector<8x32xf32>
    %92 = arith.mulf %89, %73 : vector<8x32xf32>
    %93 = arith.mulf %88, %90 : vector<8x32xf32>
    %94 = arith.addf %92, %93 : vector<8x32xf32>
    %95 = math.tanh %94 : vector<8x32xf32>
    %96 = arith.mulf %91, %95 : vector<8x32xf32>
    %cst_26 = arith.constant dense<0.000000e+00> : vector<8x128xf32>
    %97 = tpu.matmul %96, %10, %cst_26 {dimension_numbers = #tpu.dot_dimension_numbers<[1], [0], [0], [1], [0, 0, 1, 1], [], []>} : vector<8x32xf32>, vector<32x128xf32>, vector<8x128xf32> -> vector<8x128xf32>
    %98 = arith.addf %97, %13 : vector<8x128xf32>
    %c0_27 = arith.constant 0 : index
    %c384 = arith.constant 384 : index
    %99 = vector.load %arg5[%c0_27, %c384] : memref<8x1024xf32, #tpu.memory_space<vmem>>, vector<8x128xf32>
    tpu.vector_store %arg5[%c0_27, %c384], %98 {strides = array<i32>} : memref<8x1024xf32, #tpu.memory_space<vmem>>, vector<8x128xf32>,
    %100 = vector.extract_strided_slice %8 {offsets = [32, 0], sizes = [8, 128], strides = [1, 1]} : vector<64x128xf32> to vector<8x128xf32>
    %cst_28 = arith.constant dense<0.000000e+00> : vector<8x128xf32>
    %101 = tpu.matmul %96, %9, %cst_28 {dimension_numbers = #tpu.dot_dimension_numbers<[1], [0], [0], [1], [0, 0, 1, 1], [], []>} : vector<8x32xf32>, vector<32x128xf32>, vector<8x128xf32> -> vector<8x128xf32>
    %102 = arith.addf %100, %101 : vector<8x128xf32>
    %103 = arith.negf %102 : vector<8x128xf32>
    %104 = math.exp %103 : vector<8x128xf32>
    %cst_29 = arith.constant 1.000000e+00 : f32
    %105 = vector.broadcast %cst_29 : f32 to vector<8x128xf32>
    %106 = arith.addf %105, %104 : vector<8x128xf32>
    %107 = arith.divf %105, %106 : vector<8x128xf32>
    %108 = math.tanh %102 : vector<8x128xf32>
    %109 = vector.extract_strided_slice %107 {offsets = [0, 0], sizes = [8, 32], strides = [1, 1]} : vector<8x128xf32> to vector<8x32xf32>
    %110 = vector.extract_strided_slice %107 {offsets = [0, 32], sizes = [8, 32], strides = [1, 1]} : vector<8x128xf32> to vector<8x32xf32>
    %111 = vector.extract_strided_slice %108 {offsets = [0, 64], sizes = [8, 32], strides = [1, 1]} : vector<8x128xf32> to vector<8x32xf32>
    %112 = vector.extract_strided_slice %107 {offsets = [0, 96], sizes = [8, 32], strides = [1, 1]} : vector<8x128xf32> to vector<8x32xf32>
    %113 = arith.mulf %110, %94 : vector<8x32xf32>
    %114 = arith.mulf %109, %111 : vector<8x32xf32>
    %115 = arith.addf %113, %114 : vector<8x32xf32>
    %116 = math.tanh %115 : vector<8x32xf32>
    %117 = arith.mulf %112, %116 : vector<8x32xf32>
    %cst_30 = arith.constant dense<0.000000e+00> : vector<8x128xf32>
    %118 = tpu.matmul %117, %10, %cst_30 {dimension_numbers = #tpu.dot_dimension_numbers<[1], [0], [0], [1], [0, 0, 1, 1], [], []>} : vector<8x32xf32>, vector<32x128xf32>, vector<8x128xf32> -> vector<8x128xf32>
    %119 = arith.addf %118, %13 : vector<8x128xf32>
    %c0_31 = arith.constant 0 : index
    %c512 = arith.constant 512 : index
    %120 = vector.load %arg5[%c0_31, %c512] : memref<8x1024xf32, #tpu.memory_space<vmem>>, vector<8x128xf32>
    tpu.vector_store %arg5[%c0_31, %c512], %119 {strides = array<i32>} : memref<8x1024xf32, #tpu.memory_space<vmem>>, vector<8x128xf32>,
    %121 = vector.extract_strided_slice %8 {offsets = [40, 0], sizes = [8, 128], strides = [1, 1]} : vector<64x128xf32> to vector<8x128xf32>
    %cst_32 = arith.constant dense<0.000000e+00> : vector<8x128xf32>
    %122 = tpu.matmul %117, %9, %cst_32 {dimension_numbers = #tpu.dot_dimension_numbers<[1], [0], [0], [1], [0, 0, 1, 1], [], []>} : vector<8x32xf32>, vector<32x128xf32>, vector<8x128xf32> -> vector<8x128xf32>
    %123 = arith.addf %121, %122 : vector<8x128xf32>
    %124 = arith.negf %123 : vector<8x128xf32>
    %125 = math.exp %124 : vector<8x128xf32>
    %cst_33 = arith.constant 1.000000e+00 : f32
    %126 = vector.broadcast %cst_33 : f32 to vector<8x128xf32>
    %127 = arith.addf %126, %125 : vector<8x128xf32>
    %128 = arith.divf %126, %127 : vector<8x128xf32>
    %129 = math.tanh %123 : vector<8x128xf32>
    %130 = vector.extract_strided_slice %128 {offsets = [0, 0], sizes = [8, 32], strides = [1, 1]} : vector<8x128xf32> to vector<8x32xf32>
    %131 = vector.extract_strided_slice %128 {offsets = [0, 32], sizes = [8, 32], strides = [1, 1]} : vector<8x128xf32> to vector<8x32xf32>
    %132 = vector.extract_strided_slice %129 {offsets = [0, 64], sizes = [8, 32], strides = [1, 1]} : vector<8x128xf32> to vector<8x32xf32>
    %133 = vector.extract_strided_slice %128 {offsets = [0, 96], sizes = [8, 32], strides = [1, 1]} : vector<8x128xf32> to vector<8x32xf32>
    %134 = arith.mulf %131, %115 : vector<8x32xf32>
    %135 = arith.mulf %130, %132 : vector<8x32xf32>
    %136 = arith.addf %134, %135 : vector<8x32xf32>
    %137 = math.tanh %136 : vector<8x32xf32>
    %138 = arith.mulf %133, %137 : vector<8x32xf32>
    %cst_34 = arith.constant dense<0.000000e+00> : vector<8x128xf32>
    %139 = tpu.matmul %138, %10, %cst_34 {dimension_numbers = #tpu.dot_dimension_numbers<[1], [0], [0], [1], [0, 0, 1, 1], [], []>} : vector<8x32xf32>, vector<32x128xf32>, vector<8x128xf32> -> vector<8x128xf32>
    %140 = arith.addf %139, %13 : vector<8x128xf32>
    %c0_35 = arith.constant 0 : index
    %c640 = arith.constant 640 : index
    %141 = vector.load %arg5[%c0_35, %c640] : memref<8x1024xf32, #tpu.memory_space<vmem>>, vector<8x128xf32>
    tpu.vector_store %arg5[%c0_35, %c640], %140 {strides = array<i32>} : memref<8x1024xf32, #tpu.memory_space<vmem>>, vector<8x128xf32>,
    %142 = vector.extract_strided_slice %8 {offsets = [48, 0], sizes = [8, 128], strides = [1, 1]} : vector<64x128xf32> to vector<8x128xf32>
    %cst_36 = arith.constant dense<0.000000e+00> : vector<8x128xf32>
    %143 = tpu.matmul %138, %9, %cst_36 {dimension_numbers = #tpu.dot_dimension_numbers<[1], [0], [0], [1], [0, 0, 1, 1], [], []>} : vector<8x32xf32>, vector<32x128xf32>, vector<8x128xf32> -> vector<8x128xf32>
    %144 = arith.addf %142, %143 : vector<8x128xf32>
    %145 = arith.negf %144 : vector<8x128xf32>
    %146 = math.exp %145 : vector<8x128xf32>
    %cst_37 = arith.constant 1.000000e+00 : f32
    %147 = vector.broadcast %cst_37 : f32 to vector<8x128xf32>
    %148 = arith.addf %147, %146 : vector<8x128xf32>
    %149 = arith.divf %147, %148 : vector<8x128xf32>
    %150 = math.tanh %144 : vector<8x128xf32>
    %151 = vector.extract_strided_slice %149 {offsets = [0, 0], sizes = [8, 32], strides = [1, 1]} : vector<8x128xf32> to vector<8x32xf32>
    %152 = vector.extract_strided_slice %149 {offsets = [0, 32], sizes = [8, 32], strides = [1, 1]} : vector<8x128xf32> to vector<8x32xf32>
    %153 = vector.extract_strided_slice %150 {offsets = [0, 64], sizes = [8, 32], strides = [1, 1]} : vector<8x128xf32> to vector<8x32xf32>
    %154 = vector.extract_strided_slice %149 {offsets = [0, 96], sizes = [8, 32], strides = [1, 1]} : vector<8x128xf32> to vector<8x32xf32>
    %155 = arith.mulf %152, %136 : vector<8x32xf32>
    %156 = arith.mulf %151, %153 : vector<8x32xf32>
    %157 = arith.addf %155, %156 : vector<8x32xf32>
    %158 = math.tanh %157 : vector<8x32xf32>
    %159 = arith.mulf %154, %158 : vector<8x32xf32>
    %cst_38 = arith.constant dense<0.000000e+00> : vector<8x128xf32>
    %160 = tpu.matmul %159, %10, %cst_38 {dimension_numbers = #tpu.dot_dimension_numbers<[1], [0], [0], [1], [0, 0, 1, 1], [], []>} : vector<8x32xf32>, vector<32x128xf32>, vector<8x128xf32> -> vector<8x128xf32>
    %161 = arith.addf %160, %13 : vector<8x128xf32>
    %c0_39 = arith.constant 0 : index
    %c768 = arith.constant 768 : index
    %162 = vector.load %arg5[%c0_39, %c768] : memref<8x1024xf32, #tpu.memory_space<vmem>>, vector<8x128xf32>
    tpu.vector_store %arg5[%c0_39, %c768], %161 {strides = array<i32>} : memref<8x1024xf32, #tpu.memory_space<vmem>>, vector<8x128xf32>,
    %163 = vector.extract_strided_slice %8 {offsets = [56, 0], sizes = [8, 128], strides = [1, 1]} : vector<64x128xf32> to vector<8x128xf32>
    %cst_40 = arith.constant dense<0.000000e+00> : vector<8x128xf32>
    %164 = tpu.matmul %159, %9, %cst_40 {dimension_numbers = #tpu.dot_dimension_numbers<[1], [0], [0], [1], [0, 0, 1, 1], [], []>} : vector<8x32xf32>, vector<32x128xf32>, vector<8x128xf32> -> vector<8x128xf32>
    %165 = arith.addf %163, %164 : vector<8x128xf32>
    %166 = arith.negf %165 : vector<8x128xf32>
    %167 = math.exp %166 : vector<8x128xf32>
    %cst_41 = arith.constant 1.000000e+00 : f32
    %168 = vector.broadcast %cst_41 : f32 to vector<8x128xf32>
    %169 = arith.addf %168, %167 : vector<8x128xf32>
    %170 = arith.divf %168, %169 : vector<8x128xf32>
    %171 = math.tanh %165 : vector<8x128xf32>
    %172 = vector.extract_strided_slice %170 {offsets = [0, 0], sizes = [8, 32], strides = [1, 1]} : vector<8x128xf32> to vector<8x32xf32>
    %173 = vector.extract_strided_slice %170 {offsets = [0, 32], sizes = [8, 32], strides = [1, 1]} : vector<8x128xf32> to vector<8x32xf32>
    %174 = vector.extract_strided_slice %171 {offsets = [0, 64], sizes = [8, 32], strides = [1, 1]} : vector<8x128xf32> to vector<8x32xf32>
    %175 = vector.extract_strided_slice %170 {offsets = [0, 96], sizes = [8, 32], strides = [1, 1]} : vector<8x128xf32> to vector<8x32xf32>
    %176 = arith.mulf %173, %157 : vector<8x32xf32>
    %177 = arith.mulf %172, %174 : vector<8x32xf32>
    %178 = arith.addf %176, %177 : vector<8x32xf32>
    %179 = math.tanh %178 : vector<8x32xf32>
    %180 = arith.mulf %175, %179 : vector<8x32xf32>
    %cst_42 = arith.constant dense<0.000000e+00> : vector<8x128xf32>
    %181 = tpu.matmul %180, %10, %cst_42 {dimension_numbers = #tpu.dot_dimension_numbers<[1], [0], [0], [1], [0, 0, 1, 1], [], []>} : vector<8x32xf32>, vector<32x128xf32>, vector<8x128xf32> -> vector<8x128xf32>
    %182 = arith.addf %181, %13 : vector<8x128xf32>
    %c0_43 = arith.constant 0 : index
    %c896 = arith.constant 896 : index
    %183 = vector.load %arg5[%c0_43, %c896] : memref<8x1024xf32, #tpu.memory_space<vmem>>, vector<8x128xf32>
    tpu.vector_store %arg5[%c0_43, %c896], %182 {strides = array<i32>} : memref<8x1024xf32, #tpu.memory_space<vmem>>, vector<8x128xf32>,
    return
  }
}

</mosaic_0001>

<bundles_post_ra>
// kernel: lstm_pos_forward.1
= control target key start
LH: loop header
LB: loop body
LE: loop exit
PB: predicated region body
PF: predicated region fallthrough
CT: control target
= control target key end

     0   :  { %10 = vsyncpa [#allocation3], 0  ;;  %s2165_s18 = smov [#allocation2]   ;;  %s2504_s0 = inlined_call_operand.vmem [shape: s32[64,1], index: 0, kind: input, shape index: {}]   ;;  %s2505_s1 = inlined_call_operand.vmem [shape: f32[56,128], index: 1, kind: input, shape index: {}]   ;;  %s2506_s2 = inlined_call_operand.vmem [shape: f32[32,128], index: 2, kind: input, shape index: {}]   ;;  %s2507_s3 = inlined_call_operand.hbm [shape: f32[32,128], index: 3, kind: input, shape index: {}]   ;;  %s2508_s4 = inlined_call_operand.vmem [shape: f32[1,128], index: 4, kind: input, shape index: {}]   ;;  %s2509_s5 = inlined_call_operand.vmem [shape: f32[8,1024], index: 5, kind: output, shape index: {}]  }
   0x1   :  { %s22_s19 = sshll.u32 %s2165_s18, 4  ;;  %s2141_s22 = scalar_lea.hbm %s2507_s3, 512  ;;  %s23_s19 = int_to_ptr.vmem [resolvable:$true] %s22_s19 }
   0x2   :  { %p2142_p0 = scmp.ne.s32.totalorder %s2507_s3, %s2141_s22  ;;  %p2145_p1 = scmp.lt.u32.totalorder %s2141_s22, %s2507_s3 }
   0x4   :  { %p2147_p2 = pnand %p2145_p1, %p2142_p0 }
   0x6   :  { %2150 = shalt.err (!%p2147_p2)
}
   0x7   :  { %s2151_s27 = scalar_lea.vmem %s23_s19, 512  ;;  %p2156_p4 = scmp.lt.s32.totalorder %s23_s19, %s23_s19 }
   0x8   :  { %p2152_p3 = scmp.ne.s32.totalorder %s23_s19, %s2151_s27  ;;  %p2157_p5 = scmp.lt.s32.totalorder %s2151_s27, %s2151_s27 }
   0xa   :  { %p2158_p6 = por %p2157_p5, %p2156_p4 }
   0xc   :  { %p2159_p7 = pnand %p2158_p6, %p2152_p3 }
   0xe   :  { %2162 = shalt.err (!%p2159_p7)
}
   0xf   :  { %s2166_s28 = smov 128   ;;  %s2167_s29 = smov 8  }
  0x10   :  { %28 = dma.hbm_to_vmem [thread:$0]  %s2507_s3, 512, %s23_s19, [#allocation3], %s2166_s28, %s2166_s28, %s2167_s29  }
  0x11   :  { %2163 = dma.done.wait [#allocation3], 512  }
  0x12   :  { %2164 = vsyncadd [#allocation3], 4294966784  ;;  %v2168_v0 = vmov 0   ;;  %v2169_v1 = vmov 0.0|0.0   ;;  %v34_v2 = vld [vmem:[%s2504_s0] sm:$0xff]  ;;  %v35_v3 = vld [vmem:[%s2504_s0 + $0x8] sm:$0xff]  ;;  %v66_v21 = vlaneseq }
  0x13   :  { %2075 = vset.pattern.permute.xlu0 %v2168_v0  ;;  %1970 = vmatprep.subr.bf16.mxu1 %v2169_v1  ;;  %v92_v4 = vld [vmem:[%s2505_s1] sm:$0xff]  ;;  %v93_v5 = vld [vmem:[%s2505_s1 + $0x8] sm:$0xff]  ;;  %v94_v6 = vld [vmem:[%s2505_s1 + $0x10] sm:$0xff]  ;;  %vm2170_vm0 = vmmov 0   ;;  %v2171_v19 = vmov 0.0   ;;  %vm99_vm1 = vcmask 457728  }
  0x14   :  { %2076 = vset.pattern.permute.xlu1 %v2168_v0  ;;  %43 = vperm.xlu0 %2075, %v34_v2   ;;  %v95_v7 = vld [vmem:[%s2505_s1 + $0x18] sm:$0xff]  ;;  %v1958_v8 = vpack.c.bf16 %v93_v5, %v92_v4  ;;  %v229_v10 = vld [vmem:[%s2506_s2] sm:$0xff]  ;;  %v230_v11 = vld [vmem:[%s2506_s2 + $0x8] sm:$0xff]  ;;  %v2270_v22 = vand.u32 127, %v66_v21  ;;  %s2173_s6 = smov 32   ;;  %vm244_vm4 = vcmask 261120  }
  0x15   :  { %v1962_v9 = vpack.c.bf16 %v95_v7, %v94_v6  ;;  %v96_v12 = vld [vmem:[%s2505_s1 + $0x20] sm:$0xff]  ;;  %v2244_v13 = vpack.c.bf16 %v230_v11, %v229_v10  ;;  %v97_v14 = vld [vmem:[%s2505_s1 + $0x28] sm:$0xff]  ;;  %v231_v15 = vld [vmem:[%s2506_s2 + $0x10] sm:$0xff]  ;;  %1790 = vmatprep.mubr.msk.f32.mxu1 %vm2170_vm0, %v2171_v19 }
  0x16   :  { %v232_v16 = vld [vmem:[%s2506_s2 + $0x18] sm:$0xff]  ;;  %1959 = vmatprep.subr.bf16.mxu0 %v1958_v8  ;;  %v1966_v17 = vpack.c.bf16 %v97_v14, %v96_v12  ;;  %v98_v20 = vld [vmem:[%s2505_s1 + $0x30] sm:$0xff]  ;;  %s2172_s1 = smov 64   ;;  %v234_v43 = vld [vmem:[#allocation2 + $0x8] sm:$0xff] }
  0x17   :  { %1961 = vmatpush3.bf16.msra.mxu0 %v1958_v8  ;;  %1972 = vmatpush3.bf16.msra.mxu1 %v2244_v13  ;;  %v2256_v18 = vpack.c.bf16 %v232_v16, %v231_v15  ;;  %v233_v42 = vld [vmem:[#allocation2] sm:$0xff]  ;;  %v235_v44 = vld [vmem:[#allocation2 + $0x10] sm:$0xff]  ;;  %v236_v46 = vld [vmem:[#allocation2 + $0x18] sm:$0xff] }
  0x18   :  { %46 = vperm.xlu0 %2075, %v35_v3   ;;  %1963 = vmatprep.subr.bf16.mxu0 %v1962_v9  ;;  %v2280_v45 = vpack.c.bf16 %v234_v43, %v233_v42  ;;  %v2283_v47 = vpack.c.bf16 %v236_v46, %v235_v44  ;;  %v2311_v52 = vld [vmem:[%s2508_s4] ss:$0 sm:$0xff]  ;;  %v36_v3 = vld [vmem:[%s2504_s0 + $0x10] sm:$0xff]  ;;  %v37_v8 = vld [vmem:[%s2504_s0 + $0x18] sm:$0xff] }
  0x19   :  { %1973 = vmatprep.subr.bf16.mxu1 %v2169_v1 }
  0x1b   :  { %1965 = vmatpush3.bf16.msra.mxu0 %v1962_v9  ;;  %1975 = vmatpush3.bf16.msra.mxu1 %v2256_v18 }
  0x1c   :  { %1967 = vmatprep.subr.bf16.mxu0 %v1966_v17  ;;  %1976 = vmatprep.subr.bf16.mxu1 %v2169_v1 }
  0x1e   :  { %1791 = vmatmul.mubr.f32.vlgmr.msra.gmra.mrb[0].mxu1 %v2171_v19 }
  0x1f   :  { %1969 = vmatpush3.bf16.msra.mxu0 %v1966_v17  ;;  %1801 = vmatprep.mubr.msk.f32.mxu1 %vm2170_vm0, %v2171_v19 }
  0x20   :  { %1768 = vmatprep.subr.mxu0 %v98_v20  ;;  %1978 = vmatpush3.bf16.msra.mxu1 %v2280_v45 }
  0x21   :  { %1979 = vmatprep.subr.bf16.mxu1 %v2169_v1 }
  0x23   :  { %1769 = vmatpush3.msra.mxu0 %v98_v20 }
  0x24   :  { %1988 = vmatprep.subr.bf16.mxu0 %v2169_v1  ;;  %1981 = vmatpush3.bf16.msra.mxu1 %v2283_v47 }
  0x25   :  { %1982 = vmatprep.subr.bf16.mxu1 %v2169_v1 }
  0x93   :  { %v44_v23 = vpop.permute.xlu0 %43 }
  0x94   :  { %vm68_vm2 = vcmp.eq.s32.totalorder %v2270_v22, %v44_v23 }
  0x95   :  { %v1621_v24 = vsel %vm68_vm2, 1.0, %v2171_v19 }
  0x96   :  { %1770 = vmatprep.mubr.msk.f32.mxu0 %vm99_vm1, %v1621_v24 }
  0x97   :  { %v47_v25 = vpop.permute.xlu0 %46 }
  0x98   :  { %vm69_vm3 = vcmp.eq.s32.totalorder %v2270_v22, %v47_v25 }
  0x99   :  { %v1622_v26 = vsel %vm69_vm3, 1.0, %v2171_v19 }
  0x9a   :  { %1771 = vmatmul.mubr.msk.f32.vlgmr.msra.gmra.mrb[0].mxu0 %vm99_vm1, %v1622_v26 }
  0x9b   :  { %1990 = vmatpush3.bf16.msra.mxu0 %v2280_v45 }
  0x9c   :  { %1991 = vmatprep.subr.bf16.mxu0 %v2169_v1 }
  0x9f   :  { %1993 = vmatpush3.bf16.msra.mxu0 %v2283_v47 }
  0xa0   :  { %2000 = vmatprep.subr.bf16.mxu0 %v2169_v1 }
  0xf1   :  { %v314_v27 = vpop.f32.mrb[0].mxu1 }
  0xf2   :  { %v1792_v28 = vpop.f32.mrb[1].mxu1 }
 0x16d   :  { %v1772_v29 = vpop.f32.mrb[0].mxu0 }
 0x16e   :  { %v190_v30 = vpop.f32.mrb[1].mxu0 }
 0x16f   :  { %v318_v31 = vadd.f32 %v314_v27, %v190_v30 }
 0x171   :  { %2077 = vtanh.f32 %v318_v31  ;;  %v1638_v33 = vmul.f32 -1.442695, %v318_v31 }
 0x173   :  { %2079 = vpow2.f32 %v1638_v33 }
 0x17b   :  { %v2078_v32 = vpop.eup %2077 }
 0x17c   :  { %328 = vrot.lane.b32.xlu1 %v2078_v32, %s2172_s1 }
 0x17d   :  { %v2080_v34 = vpop.eup %2079 }
 0x17e   :  { %v322_v35 = vadd.f32 1.0, %v2080_v34 }
 0x180   :  { %2081 = vrcp.f32 %v322_v35 }
 0x18a   :  { %v2082_v36 = vpop.eup %2081 }
 0x18b   :  { %v326_v39 = vmul.f32 0.0, %v2082_v36 }
 0x1ee   :  { %v329_v37 = vpop.permute.xlu1 %328 }
 0x1ef   :  { %v331_v38 = vmul.f32 %v2082_v36, %v329_v37 }
 0x1f1   :  { %333 = vrot.lane.b32.xlu1 %v331_v38, %s2173_s6 }
 0x263   :  { %v334_v40 = vpop.permute.xlu1 %333 }
 0x264   :  { %v336_v41 = vadd.f32 %v334_v40, %v326_v39 }
 0x266   :  { %2083 = vtanh.f32 %v336_v41 }
 0x270   :  { %v2084_v48 = vpop.eup %2083 }
 0x271   :  { %339 = vrot.lane.b32.xlu0 %v2084_v48, %s2172_s1 }
 0x2e3   :  { %v340_v49 = vpop.permute.xlu0 %339 }
 0x2e4   :  { %v342_v50 = vmul.f32 %v2082_v36, %v340_v49 }
 0x2e6   :  { %344 = vrot.lane.b32.xlu1 %v342_v50, %s2173_s6 }
 0x358   :  { %v345_v51 = vpop.permute.xlu1 %344 }
 0x359   :  { %1802 = vmatmul.mubr.msk.f32.vlgmr.msra.gmra.mrb[2].mxu1 %vm244_vm4, %v345_v51 }
 0x35a   :  { %1984 = vmatpush3.bf16.msra.mxu1 %v2244_v13  ;;  %1812 = vmatprep.mubr.msk.f32.mxu1 %vm2170_vm0, %v2171_v19 }
 0x35b   :  { %1985 = vmatprep.subr.bf16.mxu1 %v2169_v1 }
 0x35e   :  { %1987 = vmatpush3.bf16.msra.mxu1 %v2256_v18 }
 0x35f   :  { %1994 = vmatprep.subr.bf16.mxu1 %v2169_v1 }
 0x361   :  { %1813 = vmatmul.mubr.msk.f32.vlgmr.msra.gmra.mrb[4].mxu1 %vm244_vm4, %v345_v51  ;;  %v38_v51 = vld [vmem:[%s2504_s0 + $0x20] sm:$0xff] }
 0x362   :  { %1996 = vmatpush3.bf16.msra.mxu1 %v2244_v13  ;;  %1834 = vmatprep.mubr.msk.f32.mxu1 %vm2170_vm0, %v2171_v19 }
 0x363   :  { %1997 = vmatprep.subr.bf16.mxu1 %v2169_v1 }
 0x366   :  { %1999 = vmatpush3.bf16.msra.mxu1 %v2256_v18 }
 0x367   :  { %2006 = vmatprep.subr.bf16.mxu1 %v2169_v1 }
 0x42c   :  { %v414_v53 = vpop.f32.mrb[2].mxu1 }
 0x42d   :  { %v415_v54 = vadd.f32 %v2311_v52, %v414_v53  ;;  %v1803_v55 = vpop.f32.mrb[3].mxu1 }
 0x42f   :  { %418 = vst [vmem:[%s2509_s5] sm:$0xff] %v415_v54 }
 0x434   :  { %v485_v56 = vpop.f32.mrb[4].mxu1 }
 0x435   :  { %v489_v57 = vadd.f32 %v1772_v29, %v485_v56  ;;  %v1814_v58 = vpop.f32.mrb[5].mxu1 }
 0x437   :  { %2085 = vtanh.f32 %v489_v57  ;;  %v1641_v60 = vmul.f32 -1.442695, %v489_v57  ;;  %v39_v57 = vld [vmem:[%s2504_s0 + $0x28] sm:$0xff] }
 0x439   :  { %2087 = vpow2.f32 %v1641_v60 }
 0x441   :  { %v2086_v59 = vpop.eup %2085 }
 0x442   :  { %499 = vrot.lane.b32.xlu0 %v2086_v59, %s2172_s1 }
 0x443   :  { %v2088_v61 = vpop.eup %2087 }
 0x444   :  { %v493_v62 = vadd.f32 1.0, %v2088_v61 }
 0x446   :  { %2089 = vrcp.f32 %v493_v62 }
 0x450   :  { %v2090_v63 = vpop.eup %2089 }
 0x451   :  { %v497_v4 = vmul.f32 %v2090_v63, %v336_v41 }
 0x4b4   :  { %v500_v0 = vpop.permute.xlu0 %499 }
 0x4b5   :  { %v502_v2 = vmul.f32 %v2090_v63, %v500_v0 }
 0x4b7   :  { %504 = vrot.lane.b32.xlu1 %v502_v2, %s2173_s6 }
 0x4bb   :  { %49 = vperm.xlu1 %2076, %v36_v3  }
 0x529   :  { %v505_v5 = vpop.permute.xlu1 %504 }
 0x52a   :  { %v507_v6 = vadd.f32 %v505_v5, %v497_v4 }
 0x52c   :  { %2091 = vtanh.f32 %v507_v6 }
 0x536   :  { %v2092_v7 = vpop.eup %2091 }
 0x537   :  { %510 = vrot.lane.b32.xlu0 %v2092_v7, %s2172_s1 }
 0x53a   :  { %v50_v9 = vpop.permute.xlu1 %49 }
 0x53b   :  { %52 = vperm.xlu0 %2075, %v37_v8   ;;  %vm70_vm5 = vcmp.eq.s32.totalorder %v2270_v22, %v50_v9 }
 0x53c   :  { %v1623_v10 = vsel %vm70_vm5, 1.0, %v2171_v19 }
 0x53d   :  { %1773 = vmatprep.mubr.msk.f32.mxu0 %vm99_vm1, %v1623_v10 }
 0x5a9   :  { %v511_v11 = vpop.permute.xlu0 %510 }
 0x5aa   :  { %v513_v12 = vmul.f32 %v2090_v63, %v511_v11 }
 0x5ac   :  { %515 = vrot.lane.b32.xlu1 %v513_v12, %s2173_s6 }
 0x5ba   :  { %v53_v14 = vpop.permute.xlu0 %52 }
 0x5bb   :  { %vm71_vm6 = vcmp.eq.s32.totalorder %v2270_v22, %v53_v14 }
 0x5bc   :  { %v1624_v15 = vsel %vm71_vm6, 1.0, %v2171_v19 }
 0x5bd   :  { %1774 = vmatmul.mubr.msk.f32.gmra.mrb[2].mxu0 %vm99_vm1, %v1624_v15 }
 0x61e   :  { %v2333_v16 = vpop.permute.xlu1 %515 }
 0x61f   :  { %1835 = vmatmul.mubr.msk.f32.vlgmr.msra.gmra.mrb[6].mxu1 %vm244_vm4, %v2333_v16 }
 0x620   :  { %2008 = vmatpush3.bf16.msra.mxu1 %v2244_v13  ;;  %1856 = vmatprep.mubr.msk.f32.mxu1 %vm2170_vm0, %v2171_v19 }
 0x621   :  { %2009 = vmatprep.subr.bf16.mxu1 %v2169_v1 }
 0x624   :  { %2011 = vmatpush3.bf16.msra.mxu1 %v2256_v18 }
 0x625   :  { %2018 = vmatprep.subr.bf16.mxu1 %v2169_v1 }
 0x690   :  { %v1775_v17 = vpop.f32.mrb[2].mxu0 }
 0x691   :  { %v200_v20 = vpop.f32.mrb[3].mxu0 }
 0x6f2   :  { %v656_v21 = vpop.f32.mrb[6].mxu1 }
 0x6f3   :  { %v660_v23 = vadd.f32 %v656_v21, %v200_v20  ;;  %v1836_v24 = vpop.f32.mrb[7].mxu1 }
 0x6f5   :  { %2093 = vtanh.f32 %v660_v23  ;;  %v1644_v26 = vmul.f32 -1.442695, %v660_v23 }
 0x6f7   :  { %2095 = vpow2.f32 %v1644_v26 }
 0x6ff   :  { %v2094_v25 = vpop.eup %2093 }
 0x700   :  { %670 = vrot.lane.b32.xlu0 %v2094_v25, %s2172_s1 }
 0x701   :  { %v2096_v27 = vpop.eup %2095 }
 0x702   :  { %v664_v28 = vadd.f32 1.0, %v2096_v27 }
 0x704   :  { %2097 = vrcp.f32 %v664_v28 }
 0x70e   :  { %v2098_v29 = vpop.eup %2097 }
 0x70f   :  { %v668_v32 = vmul.f32 %v2098_v29, %v507_v6 }
 0x772   :  { %v671_v30 = vpop.permute.xlu0 %670 }
 0x773   :  { %v673_v31 = vmul.f32 %v2098_v29, %v671_v30 }
 0x775   :  { %675 = vrot.lane.b32.xlu1 %v673_v31, %s2173_s6 }
 0x7e7   :  { %v676_v33 = vpop.permute.xlu1 %675 }
 0x7e8   :  { %v678_v34 = vadd.f32 %v676_v33, %v668_v32 }
 0x7ea   :  { %2099 = vtanh.f32 %v678_v34 }
 0x7f4   :  { %v2100_v35 = vpop.eup %2099 }
 0x7f5   :  { %681 = vrot.lane.b32.xlu0 %v2100_v35, %s2172_s1 }
 0x867   :  { %v682_v36 = vpop.permute.xlu0 %681 }
 0x868   :  { %v684_v37 = vmul.f32 %v2098_v29, %v682_v36  ;;  %v40_v36 = vld [vmem:[%s2504_s0 + $0x30] sm:$0xff] }
 0x86a   :  { %686 = vrot.lane.b32.xlu1 %v684_v37, %s2173_s6 }
 0x8dc   :  { %v2347_v38 = vpop.permute.xlu1 %686 }
 0x8dd   :  { %1857 = vmatmul.mubr.msk.f32.vlgmr.msra.gmra.mrb[8].mxu1 %vm244_vm4, %v2347_v38 }
 0x8de   :  { %2020 = vmatpush3.bf16.msra.mxu1 %v2244_v13  ;;  %1878 = vmatprep.mubr.msk.f32.mxu1 %vm2170_vm0, %v2171_v19 }
 0x8df   :  { %2021 = vmatprep.subr.bf16.mxu1 %v2169_v1 }
 0x8e2   :  { %2023 = vmatpush3.bf16.msra.mxu1 %v2256_v18 }
 0x8e3   :  { %2030 = vmatprep.subr.bf16.mxu1 %v2169_v1 }
 0x9b0   :  { %v827_v39 = vpop.f32.mrb[8].mxu1 }
 0x9b1   :  { %v831_v40 = vadd.f32 %v1775_v17, %v827_v39  ;;  %v1858_v41 = vpop.f32.mrb[9].mxu1 }
 0x9b3   :  { %2101 = vtanh.f32 %v831_v40  ;;  %v1647_v43 = vmul.f32 -1.442695, %v831_v40 }
 0x9b5   :  { %2103 = vpow2.f32 %v1647_v43 }
 0x9bd   :  { %v2102_v42 = vpop.eup %2101 }
 0x9be   :  { %841 = vrot.lane.b32.xlu0 %v2102_v42, %s2172_s1  ;;  %v41_v42 = vld [vmem:[%s2504_s0 + $0x38] sm:$0xff] }
 0x9bf   :  { %v2104_v44 = vpop.eup %2103 }
 0x9c0   :  { %v835_v46 = vadd.f32 1.0, %v2104_v44 }
 0x9c2   :  { %2105 = vrcp.f32 %v835_v46 }
 0x9cc   :  { %v2106_v48 = vpop.eup %2105 }
 0x9cd   :  { %v839_v53 = vmul.f32 %v2106_v48, %v678_v34 }
 0xa30   :  { %v842_v49 = vpop.permute.xlu0 %841 }
 0xa31   :  { %v844_v50 = vmul.f32 %v2106_v48, %v842_v49 }
 0xa33   :  { %846 = vrot.lane.b32.xlu1 %v844_v50, %s2173_s6 }
 0xa37   :  { %55 = vperm.xlu1 %2076, %v38_v51  }
 0xaa5   :  { %v847_v54 = vpop.permute.xlu1 %846 }
 0xaa6   :  { %v849_v55 = vadd.f32 %v847_v54, %v839_v53 }
 0xaa8   :  { %2107 = vtanh.f32 %v849_v55 }
 0xab2   :  { %v2108_v56 = vpop.eup %2107 }
 0xab3   :  { %852 = vrot.lane.b32.xlu0 %v2108_v56, %s2172_s1 }
 0xab6   :  { %v56_v58 = vpop.permute.xlu1 %55 }
 0xab7   :  { %vm72_vm7 = vcmp.eq.s32.totalorder %v2270_v22, %v56_v58  ;;  %58 = vperm.xlu0 %2075, %v39_v57  }
 0xab8   :  { %v1625_v59 = vsel %vm72_vm7, 1.0, %v2171_v19 }
 0xab9   :  { %1776 = vmatprep.mubr.msk.f32.mxu0 %vm99_vm1, %v1625_v59 }
 0xb25   :  { %v853_v60 = vpop.permute.xlu0 %852 }
 0xb26   :  { %v855_v61 = vmul.f32 %v2106_v48, %v853_v60 }
 0xb28   :  { %857 = vrot.lane.b32.xlu1 %v855_v61, %s2173_s6 }
 0xb36   :  { %v59_v62 = vpop.permute.xlu0 %58 }
 0xb37   :  { %vm73_vm8 = vcmp.eq.s32.totalorder %v2270_v22, %v59_v62 }
 0xb38   :  { %v1626_v63 = vsel %vm73_vm8, 1.0, %v2171_v19 }
 0xb39   :  { %1777 = vmatmul.mubr.msk.f32.gmra.mrb[4].mxu0 %vm99_vm1, %v1626_v63 }
 0xb9a   :  { %v2373_v0 = vpop.permute.xlu1 %857 }
 0xb9b   :  { %1879 = vmatmul.mubr.msk.f32.vlgmr.msra.gmra.mrb[10].mxu1 %vm244_vm4, %v2373_v0 }
 0xb9c   :  { %2032 = vmatpush3.bf16.msra.mxu1 %v2244_v13  ;;  %1900 = vmatprep.mubr.msk.f32.mxu1 %vm2170_vm0, %v2171_v19 }
 0xb9d   :  { %2033 = vmatprep.subr.bf16.mxu1 %v2169_v1 }
 0xba0   :  { %2035 = vmatpush3.bf16.msra.mxu1 %v2256_v18 }
 0xba1   :  { %2042 = vmatprep.subr.bf16.mxu1 %v2169_v1 }
 0xc0c   :  { %v1778_v2 = vpop.f32.mrb[4].mxu0 }
 0xc0d   :  { %v210_v3 = vpop.f32.mrb[5].mxu0 }
 0xc6e   :  { %v998_v4 = vpop.f32.mrb[10].mxu1 }
 0xc6f   :  { %v1002_v5 = vadd.f32 %v998_v4, %v210_v3  ;;  %v1880_v6 = vpop.f32.mrb[11].mxu1 }
 0xc71   :  { %2109 = vtanh.f32 %v1002_v5  ;;  %v1650_v8 = vmul.f32 -1.442695, %v1002_v5 }
 0xc73   :  { %2111 = vpow2.f32 %v1650_v8 }
 0xc7b   :  { %v2110_v7 = vpop.eup %2109 }
 0xc7c   :  { %1012 = vrot.lane.b32.xlu0 %v2110_v7, %s2172_s1 }
 0xc7d   :  { %v2112_v9 = vpop.eup %2111 }
 0xc7e   :  { %v1006_v10 = vadd.f32 1.0, %v2112_v9 }
 0xc80   :  { %2113 = vrcp.f32 %v1006_v10 }
 0xc8a   :  { %v2114_v11 = vpop.eup %2113 }
 0xc8b   :  { %v1010_v15 = vmul.f32 %v2114_v11, %v849_v55 }
 0xcee   :  { %v1013_v12 = vpop.permute.xlu0 %1012 }
 0xcef   :  { %v1015_v14 = vmul.f32 %v2114_v11, %v1013_v12 }
 0xcf1   :  { %1017 = vrot.lane.b32.xlu1 %v1015_v14, %s2173_s6 }
 0xd63   :  { %v1018_v17 = vpop.permute.xlu1 %1017 }
 0xd64   :  { %v1020_v20 = vadd.f32 %v1018_v17, %v1010_v15 }
 0xd66   :  { %2115 = vtanh.f32 %v1020_v20 }
 0xd70   :  { %v2116_v21 = vpop.eup %2115 }
 0xd71   :  { %1023 = vrot.lane.b32.xlu0 %v2116_v21, %s2172_s1 }
 0xde3   :  { %v1024_v23 = vpop.permute.xlu0 %1023 }
 0xde4   :  { %v1026_v24 = vmul.f32 %v2114_v11, %v1024_v23 }
 0xde6   :  { %1028 = vrot.lane.b32.xlu1 %v1026_v24, %s2173_s6 }
 0xe58   :  { %v1029_v25 = vpop.permute.xlu1 %1028 }
 0xe59   :  { %1901 = vmatmul.mubr.msk.f32.vlgmr.msra.gmra.mrb[12].mxu1 %vm244_vm4, %v1029_v25 }
 0xe5a   :  { %2044 = vmatpush3.bf16.msra.mxu1 %v2244_v13  ;;  %1922 = vmatprep.mubr.msk.f32.mxu1 %vm2170_vm0, %v2171_v19 }
 0xe5b   :  { %2045 = vmatprep.subr.bf16.mxu1 %v2169_v1 }
 0xe5e   :  { %2047 = vmatpush3.bf16.msra.mxu1 %v2256_v18 }
 0xe5f   :  { %2054 = vmatprep.subr.bf16.mxu1 %v2169_v1 }
 0xf2c   :  { %v1169_v26 = vpop.f32.mrb[12].mxu1 }
 0xf2d   :  { %v1173_v27 = vadd.f32 %v1778_v2, %v1169_v26  ;;  %v1902_v28 = vpop.f32.mrb[13].mxu1 }
 0xf2f   :  { %2117 = vtanh.f32 %v1173_v27  ;;  %v1653_v30 = vmul.f32 -1.442695, %v1173_v27 }
 0xf31   :  { %2119 = vpow2.f32 %v1653_v30 }
 0xf39   :  { %v2118_v29 = vpop.eup %2117 }
 0xf3a   :  { %1183 = vrot.lane.b32.xlu0 %v2118_v29, %s2172_s1 }
 0xf3b   :  { %v2120_v31 = vpop.eup %2119 }
 0xf3c   :  { %v1177_v32 = vadd.f32 1.0, %v2120_v31 }
 0xf3e   :  { %2121 = vrcp.f32 %v1177_v32 }
 0xf48   :  { %v2122_v33 = vpop.eup %2121 }
 0xf49   :  { %v1181_v37 = vmul.f32 %v2122_v33, %v1020_v20 }
 0xfac   :  { %v1184_v34 = vpop.permute.xlu0 %1183 }
 0xfad   :  { %v1186_v35 = vmul.f32 %v2122_v33, %v1184_v34 }
 0xfaf   :  { %1188 = vrot.lane.b32.xlu1 %v1186_v35, %s2173_s6 }
 0xfb3   :  { %61 = vperm.xlu1 %2076, %v40_v36  }
0x1021   :  { %v1189_v39 = vpop.permute.xlu1 %1188 }
0x1022   :  { %v2399_v40 = vadd.f32 %v1189_v39, %v1181_v37 }
0x1024   :  { %2123 = vtanh.f32 %v2399_v40 }
0x102e   :  { %v2124_v41 = vpop.eup %2123 }
0x102f   :  { %1194 = vrot.lane.b32.xlu0 %v2124_v41, %s2172_s1 }
0x1032   :  { %v62_v43 = vpop.permute.xlu1 %61 }
0x1033   :  { %vm74_vm9 = vcmp.eq.s32.totalorder %v2270_v22, %v62_v43  ;;  %64 = vperm.xlu0 %2075, %v41_v42  }
0x1034   :  { %v1627_v44 = vsel %vm74_vm9, 1.0, %v2171_v19 }
0x1035   :  { %1779 = vmatprep.mubr.msk.f32.mxu0 %vm99_vm1, %v1627_v44 }
0x10a1   :  { %v1195_v46 = vpop.permute.xlu0 %1194 }
0x10a2   :  { %v1197_v48 = vmul.f32 %v2122_v33, %v1195_v46 }
0x10a4   :  { %1199 = vrot.lane.b32.xlu1 %v1197_v48, %s2173_s6 }
0x10b2   :  { %v65_v49 = vpop.permute.xlu0 %64 }
0x10b3   :  { %vm75_vm10 = vcmp.eq.s32.totalorder %v2270_v22, %v65_v49 }
0x10b4   :  { %v1628_v50 = vsel %vm75_vm10, 1.0, %v2171_v19 }
0x10b5   :  { %1780 = vmatmul.mubr.msk.f32.gmra.mrb[6].mxu0 %vm99_vm1, %v1628_v50 }
0x10b6   :  { %1823 = vmatprep.mubr.msk.f32.mxu0 %vm2170_vm0, %v2171_v19 }
0x10b9   :  { %1824 = vmatmul.mubr.msk.f32.vlgmr.msra.gmra.mrb[8].mxu0 %vm244_vm4, %v2333_v16 }
0x10ba   :  { %2002 = vmatpush3.bf16.msra.mxu0 %v2280_v45  ;;  %1845 = vmatprep.mubr.msk.f32.mxu0 %vm2170_vm0, %v2171_v19 }
0x10bb   :  { %2003 = vmatprep.subr.bf16.mxu0 %v2169_v1 }
0x10be   :  { %2005 = vmatpush3.bf16.msra.mxu0 %v2283_v47 }
0x10bf   :  { %2012 = vmatprep.subr.bf16.mxu0 %v2169_v1 }
0x10c1   :  { %1846 = vmatmul.mubr.msk.f32.vlgmr.msra.gmra.mrb[10].mxu0 %vm244_vm4, %v2347_v38 }
0x10c2   :  { %2014 = vmatpush3.bf16.msra.mxu0 %v2280_v45  ;;  %1867 = vmatprep.mubr.msk.f32.mxu0 %vm2170_vm0, %v2171_v19 }
0x10c3   :  { %2015 = vmatprep.subr.bf16.mxu0 %v2169_v1 }
0x10c6   :  { %2017 = vmatpush3.bf16.msra.mxu0 %v2283_v47 }
0x10c7   :  { %2024 = vmatprep.subr.bf16.mxu0 %v2169_v1 }
0x10c9   :  { %1868 = vmatmul.mubr.msk.f32.vlgmr.msra.gmra.mrb[12].mxu0 %vm244_vm4, %v2373_v0 }
0x10ca   :  { %2026 = vmatpush3.bf16.msra.mxu0 %v2280_v45  ;;  %1889 = vmatprep.mubr.msk.f32.mxu0 %vm2170_vm0, %v2171_v19 }
0x10cb   :  { %2027 = vmatprep.subr.bf16.mxu0 %v2169_v1 }
0x10ce   :  { %2029 = vmatpush3.bf16.msra.mxu0 %v2283_v47 }
0x10cf   :  { %2036 = vmatprep.subr.bf16.mxu0 %v2169_v1 }
0x10d1   :  { %1890 = vmatmul.mubr.msk.f32.vlgmr.msra.gmra.mrb[14].mxu0 %vm244_vm4, %v1029_v25 }
0x10d2   :  { %2038 = vmatpush3.bf16.msra.mxu0 %v2280_v45  ;;  %1911 = vmatprep.mubr.msk.f32.mxu0 %vm2170_vm0, %v2171_v19 }
0x10d3   :  { %2039 = vmatprep.subr.bf16.mxu0 %v2169_v1 }
0x10d6   :  { %2041 = vmatpush3.bf16.msra.mxu0 %v2283_v47 }
0x10d7   :  { %2048 = vmatprep.subr.bf16.mxu0 %v2169_v1 }
0x1116   :  { %v1200_v22 = vpop.permute.xlu1 %1199 }
0x1117   :  { %1912 = vmatmul.mubr.msk.f32.vlgmr.msra.gmra.mrb[16].mxu0 %vm244_vm4, %v1200_v22  ;;  %1923 = vmatmul.mubr.msk.f32.vlgmr.msra.gmra.mrb[14].mxu1 %vm244_vm4, %v1200_v22 }
0x1118   :  { %2050 = vmatpush3.bf16.msra.mxu0 %v2280_v45  ;;  %2056 = vmatpush3.bf16.msra.mxu1 %v2244_v13 }
0x1119   :  { %2051 = vmatprep.subr.bf16.mxu0 %v2169_v1  ;;  %2057 = vmatprep.subr.bf16.mxu1 %v2169_v1 }
0x111a   :  { %1933 = vmatprep.mubr.msk.f32.mxu0 %vm2170_vm0, %v2171_v19  ;;  %1944 = vmatprep.mubr.msk.f32.mxu1 %vm2170_vm0, %v2171_v19 }
0x111c   :  { %2053 = vmatpush3.bf16.msra.mxu0 %v2283_v47  ;;  %2059 = vmatpush3.bf16.msra.mxu1 %v2256_v18 }
0x111d   :  { %2060 = vmatprep.subr.bf16.mxu0 %v2169_v1 }
0x1188   :  { %v1781_v16 = vpop.f32.mrb[6].mxu0 }
0x1189   :  { %v220_v38 = vpop.f32.mrb[7].mxu0 }
0x118c   :  { %v585_v51 = vpop.f32.mrb[8].mxu0 }
0x118d   :  { %v586_v13 = vadd.f32 %v2311_v52, %v585_v51  ;;  %v1825_v53 = vpop.f32.mrb[9].mxu0 }
0x118f   :  { %589 = vst [vmem:[%s2509_s5 + $0x8] sm:$0xff] %v586_v13 }
0x1194   :  { %v756_v54 = vpop.f32.mrb[10].mxu0 }
0x1195   :  { %v757_v55 = vadd.f32 %v2311_v52, %v756_v54  ;;  %v1847_v56 = vpop.f32.mrb[11].mxu0 }
0x1197   :  { %760 = vst [vmem:[%s2509_s5 + $0x10] sm:$0xff] %v757_v55 }
0x119c   :  { %v927_v18 = vpop.f32.mrb[12].mxu0 }
0x119d   :  { %v928_v57 = vadd.f32 %v2311_v52, %v927_v18  ;;  %v1869_v58 = vpop.f32.mrb[13].mxu0 }
0x119f   :  { %931 = vst [vmem:[%s2509_s5 + $0x18] sm:$0xff] %v928_v57 }
0x11a4   :  { %v1098_v59 = vpop.f32.mrb[14].mxu0 }
0x11a5   :  { %v1099_v60 = vadd.f32 %v2311_v52, %v1098_v59  ;;  %v1891_v61 = vpop.f32.mrb[15].mxu0 }
0x11a7   :  { %1102 = vst [vmem:[%s2509_s5 + $0x20] sm:$0xff] %v1099_v60 }
0x11ea   :  { %v1269_v62 = vpop.f32.mrb[16].mxu0  ;;  %v1340_v63 = vpop.f32.mrb[14].mxu1 }
0x11eb   :  { %v1270_v0 = vadd.f32 %v2311_v52, %v1269_v62  ;;  %v1344_v2 = vadd.f32 %v1340_v63, %v220_v38  ;;  %v1913_v3 = vpop.f32.mrb[17].mxu0  ;;  %v1924_v4 = vpop.f32.mrb[15].mxu1 }
0x11ed   :  { %1273 = vst [vmem:[%s2509_s5 + $0x28] sm:$0xff] %v1270_v0  ;;  %2125 = vtanh.f32 %v1344_v2  ;;  %v1656_v6 = vmul.f32 -1.442695, %v1344_v2 }
0x11ef   :  { %2127 = vpow2.f32 %v1656_v6 }
0x11f7   :  { %v2126_v5 = vpop.eup %2125 }
0x11f8   :  { %1354 = vrot.lane.b32.xlu0 %v2126_v5, %s2172_s1 }
0x11f9   :  { %v2128_v7 = vpop.eup %2127 }
0x11fa   :  { %v1348_v8 = vadd.f32 1.0, %v2128_v7 }
0x11fc   :  { %2129 = vrcp.f32 %v1348_v8 }
0x1206   :  { %v2130_v9 = vpop.eup %2129 }
0x1207   :  { %v1352_v12 = vmul.f32 %v2130_v9, %v2399_v40 }
0x126a   :  { %v1355_v10 = vpop.permute.xlu0 %1354 }
0x126b   :  { %v1357_v11 = vmul.f32 %v2130_v9, %v1355_v10 }
0x126d   :  { %1359 = vrot.lane.b32.xlu1 %v1357_v11, %s2173_s6 }
0x12df   :  { %v1360_v14 = vpop.permute.xlu1 %1359 }
0x12e0   :  { %v1362_v15 = vadd.f32 %v1360_v14, %v1352_v12 }
0x12e2   :  { %2131 = vtanh.f32 %v1362_v15 }
0x12ec   :  { %v2132_v17 = vpop.eup %2131 }
0x12ed   :  { %1365 = vrot.lane.b32.xlu0 %v2132_v17, %s2172_s1 }
0x135f   :  { %v1366_v20 = vpop.permute.xlu0 %1365 }
0x1360   :  { %v1368_v21 = vmul.f32 %v2130_v9, %v1366_v20 }
0x1362   :  { %1370 = vrot.lane.b32.xlu1 %v1368_v21, %s2173_s6 }
0x13d4   :  { %v1371_v23 = vpop.permute.xlu1 %1370 }
0x13d5   :  { %1934 = vmatmul.mubr.msk.f32.vlgmr.msra.gmra.mrb[18].mxu0 %vm244_vm4, %v1371_v23  ;;  %1945 = vmatmul.mubr.msk.f32.vlgmr.msra.gmra.mrb[16].mxu1 %vm244_vm4, %v1371_v23 }
0x13d6   :  { %2062 = vmatpush3.bf16.msra.mxu0 %v2280_v45  ;;  %1955 = vmatprep.mubr.msk.f32.mxu0 %vm2170_vm0, %v2171_v19 }
0x13d7   :  { %2063 = vmatprep.subr.bf16.mxu0 %v2169_v1 }
0x13da   :  { %2065 = vmatpush3.bf16.msra.mxu0 %v2283_v47 }
0x14a8   :  { %v1440_v24 = vpop.f32.mrb[18].mxu0  ;;  %v1511_v25 = vpop.f32.mrb[16].mxu1 }
0x14a9   :  { %v1441_v26 = vadd.f32 %v2311_v52, %v1440_v24  ;;  %v1515_v27 = vadd.f32 %v1781_v16, %v1511_v25  ;;  %v1935_v28 = vpop.f32.mrb[19].mxu0  ;;  %v1946_v29 = vpop.f32.mrb[17].mxu1 }
0x14ab   :  { %1444 = vst [vmem:[%s2509_s5 + $0x30] sm:$0xff] %v1441_v26  ;;  %2133 = vtanh.f32 %v1515_v27  ;;  %v1659_v19 = vmul.f32 -1.442695, %v1515_v27 }
0x14ad   :  { %2135 = vpow2.f32 %v1659_v19 }
0x14b5   :  { %v2134_v45 = vpop.eup %2133 }
0x14b6   :  { %1525 = vrot.lane.b32.xlu0 %v2134_v45, %s2172_s1 }
0x14b7   :  { %v2136_v1 = vpop.eup %2135 }
0x14b8   :  { %v1519_v30 = vadd.f32 1.0, %v2136_v1 }
0x14ba   :  { %2137 = vrcp.f32 %v1519_v30 }
0x14c4   :  { %v2138_v47 = vpop.eup %2137 }
0x14c5   :  { %v1523_v33 = vmul.f32 %v2138_v47, %v1362_v15 }
0x1528   :  { %v1526_v31 = vpop.permute.xlu0 %1525 }
0x1529   :  { %v1528_v32 = vmul.f32 %v2138_v47, %v1526_v31 }
0x152b   :  { %1530 = vrot.lane.b32.xlu1 %v1528_v32, %s2173_s6 }
0x159d   :  { %v1531_v34 = vpop.permute.xlu1 %1530 }
0x159e   :  { %v1533_v35 = vadd.f32 %v1531_v34, %v1523_v33 }
0x15a0   :  { %2139 = vtanh.f32 %v1533_v35 }
0x15aa   :  { %v2140_v36 = vpop.eup %2139 }
0x15ab   :  { %1536 = vrot.lane.b32.xlu0 %v2140_v36, %s2172_s1 }
0x161d   :  { %v1537_v37 = vpop.permute.xlu0 %1536 }
0x161e   :  { %v1539_v39 = vmul.f32 %v2138_v47, %v1537_v37 }
0x1620   :  { %1541 = vrot.lane.b32.xlu1 %v1539_v39, %s2173_s6 }
0x1692   :  { %v1542_v40 = vpop.permute.xlu1 %1541 }
0x1693   :  { %1956 = vmatmul.mubr.msk.f32.vlgmr.msra.gmra.mrb[20].mxu0 %vm244_vm4, %v1542_v40 }
0x1766   :  { %v1611_v41 = vpop.f32.mrb[20].mxu0 }
0x1767   :  { %v1612_v42 = vadd.f32 %v2311_v52, %v1611_v41  ;;  %v1957_v43 = vpop.f32.mrb[21].mxu0 }
0x1769   :  { %1615 = vst [vmem:[%s2509_s5 + $0x38] sm:$0xff] %v1612_v42 }
0x176a   :  { %1620 = vsyncpa [#allocation3], 1 }

</bundles_post_ra>
